<compile_context>
chip_gen: v6e
topology: v6e:2x2x1
jax: 0.10.0
libtpu: 0.0.40
codegen_flags: <defaults>
</compile_context>

<pallas_src>
import functools

import jax
import jax.numpy as jnp
from jax import lax
from jax.experimental import pallas as pl
from jax.experimental.pallas import tpu as pltpu


def _round_up(x, m):
    return ((x + m - 1) // m) * m


# ----------------------------------------------------------------------------
# Pallas kernels
# ----------------------------------------------------------------------------
def lstm_kernel(x_ref, mask_ref, w_in_ref, b_ref, w_rec_ref, out_ref,
                gx_ref, hf_ref, hb_ref, *, hidden, out_width):
    """Bidirectional LSTM with fused mask multiply and lane-dense output.

    Gate layout (width 8H): [i_f|i_b|f_f|f_b|g_f|g_b|o_f|o_b], each block H.
    State layout (width 2H): [h_f | h_b], [c_f | c_b].
    """
    L, N, Din = x_ref.shape
    H = hidden
    S = 2 * H          # combined state width
    G = 4 * S          # combined gate width (8H)

    # ---- Phase 1: hoisted input projection (one big MXU matmul, both dirs).
    x2 = x_ref[...].reshape(L * N, Din)
    gx = jnp.dot(x2, w_in_ref[...], preferred_element_type=jnp.float32) + b_ref[...]
    gx_ref[...] = gx.reshape(L, N, G)

    # ---- Phase 2: recurrence. One merged (N,2H)x(2H,8H) matmul per step.
    w_rec = w_rec_ref[...]
    # Hoisted lane mask selecting forward-direction lanes within each gate.
    fwd_lane = (lax.broadcasted_iota(jnp.int32, (N, G), 1) % S) < H

    h0 = jnp.zeros((N, S), jnp.float32)

    def body(t, carry):
        h, c = carry
        tb = L - 1 - t
        # fwd gates come from x[t], bwd gates from x[L-1-t]: cheap VPU select.
        gx_sel = jnp.where(fwd_lane, gx_ref[t], gx_ref[tb])
        gates = gx_sel + jnp.dot(h, w_rec, preferred_element_type=jnp.float32)
        i = jax.nn.sigmoid(gates[:, 0 * S:1 * S])
        f = jax.nn.sigmoid(gates[:, 1 * S:2 * S])
        g = jnp.tanh(gates[:, 2 * S:3 * S])
        o = jax.nn.sigmoid(gates[:, 3 * S:4 * S])
        c_new = f * c + i * g
        h_new = o * jnp.tanh(c_new)
        hf_ref[t] = h_new[:, :H]        # forward hidden for time t
        hb_ref[tb] = h_new[:, H:]       # backward hidden for time L-1-t
        return (h_new, c_new)

    lax.fori_loop(0, L, body, (h0, h0))

    # ---- Phase 3: fused mask multiply + single lane-dense padded store.
    m = mask_ref[...]                                   # (L, N, 1)
    y = jnp.concatenate([hf_ref[...], hb_ref[...]], axis=-1) * m   # (L, N, 2H)
    pad = out_width - S
    if pad > 0:
        y = jnp.concatenate(
            [y, jnp.zeros((L, N, pad), jnp.float32)], axis=-1)
    out_ref[...] = y


def _layernorm(z, gamma, beta, eps=1e-5):
    mean = jnp.mean(z, axis=-1, keepdims=True)
    var = jnp.mean((z - mean) ** 2, axis=-1, keepdims=True)
    return (z - mean) * lax.rsqrt(var + eps) * gamma + beta


def mlp_kernel(y_ref, w1_ref, b1_ref, g1_ref, be1_ref,
               w2_ref, b2_ref, g2_ref, be2_ref,
               w3_ref, b3_ref, out_ref):
    # Linear -> ReLU -> LayerNorm
    z = jnp.dot(y_ref[...], w1_ref[...], preferred_element_type=jnp.float32) + b1_ref[...]
    z = jnp.maximum(z, 0.0)
    z = _layernorm(z, g1_ref[...], be1_ref[...])
    # Linear -> ReLU -> LayerNorm
    z = jnp.dot(z, w2_ref[...], preferred_element_type=jnp.float32) + b2_ref[...]
    z = jnp.maximum(z, 0.0)
    z = _layernorm(z, g2_ref[...], be2_ref[...])
    # final projection (output lane-padded to 128 -> unmasked vector stores)
    out_ref[...] = jnp.dot(z, w3_ref[...], preferred_element_type=jnp.float32) + b3_ref[...]


# ----------------------------------------------------------------------------
# Wrappers
# ----------------------------------------------------------------------------
_VMEM = pl.BlockSpec(memory_space=pltpu.MemorySpace.VMEM)


def _interleave_gates(af, ab, H):
    """[i|f|g|o] fwd (…,4H) + [i|f|g|o] bwd (…,4H) -> (…,8H) interleaved
    as [i_f|i_b|f_f|f_b|g_f|g_b|o_f|o_b]."""
    lead = af.shape[:-1]
    af4 = af.reshape(*lead, 4, H)
    ab4 = ab.reshape(*lead, 4, H)
    return jnp.concatenate([af4, ab4], axis=-1).reshape(*lead, 8 * H)


def lstm_pallas(x, mask, p, out_width):
    """x: (L, N_pad, Din), mask: (L, N_pad). Returns masked (L, N_pad, out_width)."""
    L, N, Din = x.shape
    H = p["w_hh_f"].shape[1]
    S = 2 * H
    G = 4 * S

    wih_f_t = p["w_ih_f"].T                         # (Din, 4H)
    wih_b_t = p["w_ih_b"].T
    whh_f_t = p["w_hh_f"].T                         # (H, 4H)
    whh_b_t = p["w_hh_b"].T
    b_f = (p["b_ih_f"] + p["b_hh_f"]).reshape(1, -1)
    b_b = (p["b_ih_b"] + p["b_hh_b"]).reshape(1, -1)

    w_in = _interleave_gates(wih_f_t, wih_b_t, H)   # (Din, 8H)
    b_comb = _interleave_gates(b_f, b_b, H)         # (1, 8H)
    zH = jnp.zeros_like(whh_f_t)
    w_rec = jnp.concatenate(                         # block-diagonal (2H, 8H)
        [_interleave_gates(whh_f_t, zH, H),
         _interleave_gates(zH, whh_b_t, H)], axis=0)

    mask3 = mask[..., None].astype(jnp.float32)     # (L, N, 1)

    kernel = functools.partial(lstm_kernel, hidden=H, out_width=out_width)
    flops = 2 * L * N * Din * G + 2 * L * N * S * G
    bytes_acc = 4 * (L * N * (Din + 1 + out_width) + Din * G + S * G + G)

    out = pl.pallas_call(
        kernel,
        out_shape=jax.ShapeDtypeStruct((L, N, out_width), jnp.float32),
        in_specs=[_VMEM] * 5,
        out_specs=_VMEM,
        scratch_shapes=[
            pltpu.VMEM((L, N, G), jnp.float32),     # precomputed input gates
            pltpu.VMEM((L, N, H), jnp.float32),     # forward hidden states
            pltpu.VMEM((L, N, H), jnp.float32),     # backward hidden states
        ],
        cost_estimate=pl.CostEstimate(
            flops=int(flops),
            transcendentals=int(5 * L * N * S),
            bytes_accessed=int(bytes_acc)),
    )(x, mask3, w_in, b_comb, w_rec)
    return out


def mlp_pallas(y, p, f_out):
    """y: (L, N_pad, D_in) already masked, zero lanes beyond 2H. Returns (L, N_pad, f_out)."""
    L, N, D_in = y.shape
    M = L * N
    twoE = p["w1"].shape[1]                          # 2E
    H1 = p["w1"].shape[0]                            # 4E
    F_pad = _round_up(max(f_out, 1), 128)

    # Zero-pad w1's input dim to consume the lane-padded LSTM output directly,
    # and w3/b3's output dim to a lane-dense 128-wide projection.
    w1_pad = jnp.zeros((D_in, H1), jnp.float32).at[:twoE, :].set(p["w1"].T)
    w2_t = p["w2"].T                                 # (4E, 4E)
    w3_pad = jnp.zeros((H1, F_pad), jnp.float32).at[:, :f_out].set(p["w3"].T)
    b3_pad = jnp.zeros((1, F_pad), jnp.float32).at[:, :f_out].set(p["b3"].reshape(1, -1))

    y2 = y.reshape(M, D_in)
    tile_m = 512 if M >= 512 else _round_up(M, 8)
    M_pad = _round_up(M, tile_m)
    if M_pad != M:
        y2 = jnp.pad(y2, ((0, M_pad - M), (0, 0)))
    grid = (M_pad // tile_m,)

    def full(shape):
        return pl.BlockSpec(shape, lambda i, _n=len(shape): (0,) * _n)

    flops = 2 * M_pad * (D_in * H1 + H1 * H1 + H1 * F_pad)
    bytes_acc = 4 * (M_pad * (D_in + F_pad) + D_in * H1 + H1 * H1 + H1 * F_pad)

    out = pl.pallas_call(
        mlp_kernel,
        out_shape=jax.ShapeDtypeStruct((M_pad, F_pad), jnp.float32),
        grid=grid,
        in_specs=[pl.BlockSpec((tile_m, D_in), lambda i: (i, 0)),
                  full((D_in, H1)), full((1, H1)), full((1, H1)), full((1, H1)),
                  full((H1, H1)), full((1, H1)), full((1, H1)), full((1, H1)),
                  full((H1, F_pad)), full((1, F_pad))],
        out_specs=pl.BlockSpec((tile_m, F_pad), lambda i: (i, 0)),
        compiler_params=pltpu.CompilerParams(
            dimension_semantics=("parallel",)),
        cost_estimate=pl.CostEstimate(
            flops=int(flops),
            transcendentals=int(2 * M_pad),
            bytes_accessed=int(bytes_acc)),
    )(y2, w1_pad,
      p["b1"].reshape(1, -1), p["g1"].reshape(1, -1), p["be1"].reshape(1, -1),
      w2_t,
      p["b2"].reshape(1, -1), p["g2"].reshape(1, -1), p["be2"].reshape(1, -1),
      w3_pad, b3_pad)
    return out[:M, :f_out].reshape(L, N, f_out)


def onlyfams_onehot_forward(x, mask, params):
    L, N, _ = x.shape
    H = params["w_hh_f"].shape[1]
    f_out = params["w3"].shape[0]

    # Pad batch to a multiple of 8 sublanes once (mask pads with zeros).
    N_pad = _round_up(N, 8)
    if N_pad != N:
        x = jnp.pad(x, ((0, 0), (0, N_pad - N), (0, 0)))
        mask = jnp.pad(mask, ((0, 0), (0, N_pad - N)))

    out_width = _round_up(2 * H, 128)                # lane-dense LSTM output
    y = lstm_pallas(x, mask, params, out_width)      # (L, N_pad, out_width), masked
    out = mlp_pallas(y, params, f_out)               # (L, N_pad, f_out)
    return out[:, :N, :]


# ----------------------------------------------------------------------------
# Deterministic parameter init (shapes follow OnlyFams_onehot.__init__)
# ----------------------------------------------------------------------------
def make_params(key, embed_dim, input_dim, f_out):
    H, E, Din = embed_dim, embed_dim, input_dim
    k = 1.0 / jnp.sqrt(jnp.float32(H))
    keys = jax.random.split(key, 24)
    u = lambda kk, shape, s: jax.random.uniform(kk, shape, jnp.float32, -s, s)
    p = {
        # LSTM forward direction
        "w_ih_f": u(keys[0], (4 * H, Din), k),
        "w_hh_f": u(keys[1], (4 * H, H), k),
        "b_ih_f": u(keys[2], (4 * H,), k),
        "b_hh_f": u(keys[3], (4 * H,), k),
        # LSTM backward direction
        "w_ih_b": u(keys[4], (4 * H, Din), k),
        "w_hh_b": u(keys[5], (4 * H, H), k),
        "b_ih_b": u(keys[6], (4 * H,), k),
        "b_hh_b": u(keys[7], (4 * H,), k),
        # Linear(2E -> 4E), LayerNorm(4E)
        "w1": u(keys[8], (4 * E, 2 * E), 1.0 / jnp.sqrt(jnp.float32(2 * E))),
        "b1": u(keys[9], (4 * E,), 1.0 / jnp.sqrt(jnp.float32(2 * E))),
        "g1": jnp.ones((4 * E,), jnp.float32),
        "be1": jnp.zeros((4 * E,), jnp.float32),
        # Linear(4E -> 4E), LayerNorm(4E)
        "w2": u(keys[10], (4 * E, 4 * E), 1.0 / jnp.sqrt(jnp.float32(4 * E))),
        "b2": u(keys[11], (4 * E,), 1.0 / jnp.sqrt(jnp.float32(4 * E))),
        "g2": jnp.ones((4 * E,), jnp.float32),
        "be2": jnp.zeros((4 * E,), jnp.float32),
        # Linear(4E -> f)
        "w3": u(keys[12], (f_out, 4 * E), 1.0 / jnp.sqrt(jnp.float32(4 * E))),
        "b3": u(keys[13], (f_out,), 1.0 / jnp.sqrt(jnp.float32(4 * E))),
    }
    return p


# ----------------------------------------------------------------------------
# Pure-JAX reference (for correctness check only)
# ----------------------------------------------------------------------------
def reference_forward(x, mask, p):
    L, N, _ = x.shape
    H = p["w_hh_f"].shape[1]

    def cell(xt, h, c, wih, whh, bih, bhh):
        g = xt @ wih.T + bih + h @ whh.T + bhh
        i = jax.nn.sigmoid(g[:, :H])
        f = jax.nn.sigmoid(g[:, H:2 * H])
        gg = jnp.tanh(g[:, 2 * H:3 * H])
        o = jax.nn.sigmoid(g[:, 3 * H:])
        c = f * c + i * gg
        return o * jnp.tanh(c), c

    h = c = jnp.zeros((N, H), jnp.float32)
    fwd = []
    for t in range(L):
        h, c = cell(x[t], h, c, p["w_ih_f"], p["w_hh_f"], p["b_ih_f"], p["b_hh_f"])
        fwd.append(h)
    h = c = jnp.zeros((N, H), jnp.float32)
    bwd = [None] * L
    for t in reversed(range(L)):
        h, c = cell(x[t], h, c, p["w_ih_b"], p["w_hh_b"], p["b_ih_b"], p["b_hh_b"])
        bwd[t] = h
    y = jnp.concatenate([jnp.stack(fwd), jnp.stack(bwd)], axis=-1)  # (L, N, 2H)

    y = y * mask[..., None]

    def ln(z, g, b, eps=1e-5):
        m = jnp.mean(z, -1, keepdims=True)
        v = jnp.mean((z - m) ** 2, -1, keepdims=True)
        return (z - m) / jnp.sqrt(v + eps) * g + b

    z = jnp.maximum(y @ p["w1"].T + p["b1"], 0.0)
    z = ln(z, p["g1"], p["be1"])
    z = jnp.maximum(z @ p["w2"].T + p["b2"], 0.0)
    z = ln(z, p["g2"], p["be2"])
    return z @ p["w3"].T + p["b3"]


# ----------------------------------------------------------------------------
if __name__ == "__main__":
    # Small shapes consistent with the module's forward.
    L, N = 8, 2            # seq length, batch
    input_dim = 33         # module default
    embed_dim = 32
    # clan_family_matrix: (num_clans, num_families) -> f = shape[1]
    clan_family_matrix = jnp.eye(4, 16, dtype=jnp.float32)
    f_out = clan_family_matrix.shape[1]

    key = jax.random.PRNGKey(0)
    kx, km, kp = jax.random.split(key, 3)
    x = jax.random.normal(kx, (L, N, input_dim), jnp.float32)
    mask = (jax.random.uniform(km, (L, N)) > 0.2).astype(jnp.float32)
    params = make_params(kp, embed_dim, input_dim, f_out)

    out = onlyfams_onehot_forward(x, mask, params)
    out = jax.block_until_ready(out)

    ref = reference_forward(x, mask, params)
    assert out.shape == (L, N, f_out)
    assert jnp.allclose(out, ref, rtol=1e-2, atol=1e-2), float(jnp.max(jnp.abs(out - ref)))

    print("KERNEL_OK")
</pallas_src>

<mosaic_0001>
module attributes {stable_mosaic.version = 11 : i64} {
  func.func @lstm_kernel(%arg0: memref<8x8x33xf32, #tpu.memory_space<vmem>>, %arg1: memref<8x8x1xf32, #tpu.memory_space<vmem>>, %arg2: memref<33x256xf32, #tpu.memory_space<vmem>>, %arg3: memref<1x256xf32, #tpu.memory_space<vmem>>, %arg4: memref<64x256xf32, #tpu.memory_space<vmem>>, %arg5: memref<8x8x128xf32, #tpu.memory_space<vmem>>, %arg6: memref<8x8x256xf32, #tpu.memory_space<vmem>>, %arg7: memref<8x8x32xf32, #tpu.memory_space<vmem>>, %arg8: memref<8x8x32xf32, #tpu.memory_space<vmem>>) attributes {dimension_semantics = [], scalar_prefetch = 0 : i64, scratch_operands = 3 : i64, tpu.core_type = #tpu.core_type<tc>} {
    %c0 = arith.constant 0 : index
    %c0_0 = arith.constant 0 : index
    %c0_1 = arith.constant 0 : index
    %0 = vector.load %arg0[%c0, %c0_0, %c0_1] : memref<8x8x33xf32, #tpu.memory_space<vmem>>, vector<8x8x33xf32>
    %1 = vector.shape_cast %0 : vector<8x8x33xf32> to vector<64x33xf32>
    %c0_2 = arith.constant 0 : index
    %c0_3 = arith.constant 0 : index
    %2 = vector.load %arg2[%c0_2, %c0_3] : memref<33x256xf32, #tpu.memory_space<vmem>>, vector<33x256xf32>
    %cst = arith.constant dense<0.000000e+00> : vector<64x256xf32>
    %3 = tpu.matmul %1, %2, %cst {dimension_numbers = #tpu.dot_dimension_numbers<[1], [0], [0], [1], [0, 0, 1, 1], [], []>} : vector<64x33xf32>, vector<33x256xf32>, vector<64x256xf32> -> vector<64x256xf32>
    %c0_4 = arith.constant 0 : index
    %c0_5 = arith.constant 0 : index
    %4 = vector.load %arg3[%c0_4, %c0_5] : memref<1x256xf32, #tpu.memory_space<vmem>>, vector<1x256xf32>
    %5 = vector.broadcast %4 : vector<1x256xf32> to vector<64x256xf32>
    %6 = arith.addf %3, %5 : vector<64x256xf32>
    %7 = vector.shape_cast %6 : vector<64x256xf32> to vector<8x8x256xf32>
    %c0_6 = arith.constant 0 : index
    %c0_7 = arith.constant 0 : index
    %c0_8 = arith.constant 0 : index
    %8 = vector.load %arg6[%c0_6, %c0_7, %c0_8] : memref<8x8x256xf32, #tpu.memory_space<vmem>>, vector<8x8x256xf32>
    tpu.vector_store %arg6[%c0_6, %c0_7, %c0_8], %7 {strides = array<i32>} : memref<8x8x256xf32, #tpu.memory_space<vmem>>, vector<8x8x256xf32>,
    %c0_9 = arith.constant 0 : index
    %c0_10 = arith.constant 0 : index
    %9 = vector.load %arg4[%c0_9, %c0_10] : memref<64x256xf32, #tpu.memory_space<vmem>>, vector<64x256xf32>
    %10 = tpu.iota {dimensions = array<i32: 1>} : vector<8x256xi32>
    %c64_i32 = arith.constant 64 : i32
    %c0_i32 = arith.constant 0 : i32
    %11 = arith.cmpi eq, %c64_i32, %c0_i32 : i32
    %c1_i32 = arith.constant 1 : i32
    %12 = arith.select %11, %c1_i32, %c64_i32 : i32
    %13 = vector.broadcast %12 : i32 to vector<8x256xi32>
    %14 = arith.remsi %10, %13 : vector<8x256xi32>
    %c0_i32_11 = arith.constant 0 : i32
    %15 = vector.broadcast %c0_i32_11 : i32 to vector<8x256xi32>
    %16 = arith.cmpi ne, %14, %15 : vector<8x256xi32>
    %c0_i32_12 = arith.constant 0 : i32
    %17 = vector.broadcast %c0_i32_12 : i32 to vector<8x256xi32>
    %18 = arith.cmpi slt, %14, %17 : vector<8x256xi32>
    %c0_i32_13 = arith.constant 0 : i32
    %19 = arith.cmpi slt, %12, %c0_i32_13 : i32
    %20 = vector.broadcast %19 : i1 to vector<8x256xi1>
    %21 = vector.broadcast %20 : vector<8x256xi1> to vector<8x256xi1>
    %22 = arith.xori %18, %21 : vector<8x256xi1>
    %23 = arith.andi %22, %16 : vector<8x256xi1>
    %24 = vector.broadcast %12 : i32 to vector<8x256xi32>
    %25 = arith.addi %14, %24 : vector<8x256xi32>
    %26 = arith.select %23, %25, %14 : vector<8x256xi1>, vector<8x256xi32>
    %c32_i32 = arith.constant 32 : i32
    %27 = vector.broadcast %c32_i32 : i32 to vector<8x256xi32>
    %28 = arith.cmpi slt, %26, %27 : vector<8x256xi32>
    %cst_14 = arith.constant 0.000000e+00 : f32
    %29 = vector.broadcast %cst_14 : f32 to vector<8x64xf32>
    %c0_i32_15 = arith.constant 0 : i32
    %c8_i32 = arith.constant 8 : i32
    %30 = arith.addi %c0_i32_15, %c8_i32 : i32
    %c1_i32_16 = arith.constant 1 : i32
    %31:2 = scf.for %arg9 = %c0_i32_15 to %30 step %c1_i32_16 iter_args(%arg10 = %29, %arg11 = %29) -> (vector<8x64xf32>, vector<8x64xf32>)  : i32 {
      %c7_i32 = arith.constant 7 : i32
      %41 = arith.subi %c7_i32, %arg9 : i32
      %42 = arith.index_cast %arg9 : i32 to index
      %c0_31 = arith.constant 0 : index
      %c0_32 = arith.constant 0 : index
      %43 = vector.load %arg6[%42, %c0_31, %c0_32] : memref<8x8x256xf32, #tpu.memory_space<vmem>>, vector<1x8x256xf32>
      %44 = vector.shape_cast %43 : vector<1x8x256xf32> to vector<8x256xf32>
      %45 = arith.index_cast %41 : i32 to index
      %c0_33 = arith.constant 0 : index
      %c0_34 = arith.constant 0 : index
      %46 = vector.load %arg6[%45, %c0_33, %c0_34] : memref<8x8x256xf32, #tpu.memory_space<vmem>>, vector<1x8x256xf32>
      %47 = vector.shape_cast %46 : vector<1x8x256xf32> to vector<8x256xf32>
      %48 = arith.select %28, %44, %47 : vector<8x256xi1>, vector<8x256xf32>
      %cst_35 = arith.constant dense<0.000000e+00> : vector<8x256xf32>
      %49 = tpu.matmul %arg10, %9, %cst_35 {dimension_numbers = #tpu.dot_dimension_numbers<[1], [0], [0], [1], [0, 0, 1, 1], [], []>} : vector<8x64xf32>, vector<64x256xf32>, vector<8x256xf32> -> vector<8x256xf32>
      %50 = arith.addf %48, %49 : vector<8x256xf32>
      %51 = vector.extract_strided_slice %50 {offsets = [0, 0], sizes = [8, 64], strides = [1, 1]} : vector<8x256xf32> to vector<8x64xf32>
      %52 = arith.negf %51 : vector<8x64xf32>
      %53 = math.exp %52 : vector<8x64xf32>
      %cst_36 = arith.constant 1.000000e+00 : f32
      %54 = vector.broadcast %cst_36 : f32 to vector<8x64xf32>
      %55 = arith.addf %54, %53 : vector<8x64xf32>
      %56 = arith.divf %54, %55 : vector<8x64xf32>
      %57 = vector.extract_strided_slice %50 {offsets = [0, 64], sizes = [8, 64], strides = [1, 1]} : vector<8x256xf32> to vector<8x64xf32>
      %58 = arith.negf %57 : vector<8x64xf32>
      %59 = math.exp %58 : vector<8x64xf32>
      %cst_37 = arith.constant 1.000000e+00 : f32
      %60 = vector.broadcast %cst_37 : f32 to vector<8x64xf32>
      %61 = arith.addf %60, %59 : vector<8x64xf32>
      %62 = arith.divf %60, %61 : vector<8x64xf32>
      %63 = vector.extract_strided_slice %50 {offsets = [0, 128], sizes = [8, 64], strides = [1, 1]} : vector<8x256xf32> to vector<8x64xf32>
      %64 = math.tanh %63 : vector<8x64xf32>
      %65 = vector.extract_strided_slice %50 {offsets = [0, 192], sizes = [8, 64], strides = [1, 1]} : vector<8x256xf32> to vector<8x64xf32>
      %66 = arith.negf %65 : vector<8x64xf32>
      %67 = math.exp %66 : vector<8x64xf32>
      %cst_38 = arith.constant 1.000000e+00 : f32
      %68 = vector.broadcast %cst_38 : f32 to vector<8x64xf32>
      %69 = arith.addf %68, %67 : vector<8x64xf32>
      %70 = arith.divf %68, %69 : vector<8x64xf32>
      %71 = arith.mulf %62, %arg11 : vector<8x64xf32>
      %72 = arith.mulf %56, %64 : vector<8x64xf32>
      %73 = arith.addf %71, %72 : vector<8x64xf32>
      %74 = math.tanh %73 : vector<8x64xf32>
      %75 = arith.mulf %70, %74 : vector<8x64xf32>
      %76 = vector.extract_strided_slice %75 {offsets = [0, 0], sizes = [8, 32], strides = [1, 1]} : vector<8x64xf32> to vector<8x32xf32>
      %77 = arith.index_cast %arg9 : i32 to index
      %c0_39 = arith.constant 0 : index
      %c0_40 = arith.constant 0 : index
      %78 = vector.load %arg7[%77, %c0_39, %c0_40] : memref<8x8x32xf32, #tpu.memory_space<vmem>>, vector<1x8x32xf32>
      %79 = vector.shape_cast %78 : vector<1x8x32xf32> to vector<8x32xf32>
      %80 = vector.shape_cast %76 : vector<8x32xf32> to vector<1x8x32xf32>
      tpu.vector_store %arg7[%77, %c0_39, %c0_40], %80 {strides = array<i32>} : memref<8x8x32xf32, #tpu.memory_space<vmem>>, vector<1x8x32xf32>,
      %81 = vector.extract_strided_slice %75 {offsets = [0, 32], sizes = [8, 32], strides = [1, 1]} : vector<8x64xf32> to vector<8x32xf32>
      %82 = arith.index_cast %41 : i32 to index
      %c0_41 = arith.constant 0 : index
      %c0_42 = arith.constant 0 : index
      %83 = vector.load %arg8[%82, %c0_41, %c0_42] : memref<8x8x32xf32, #tpu.memory_space<vmem>>, vector<1x8x32xf32>
      %84 = vector.shape_cast %83 : vector<1x8x32xf32> to vector<8x32xf32>
      %85 = vector.shape_cast %81 : vector<8x32xf32> to vector<1x8x32xf32>
      tpu.vector_store %arg8[%82, %c0_41, %c0_42], %85 {strides = array<i32>} : memref<8x8x32xf32, #tpu.memory_space<vmem>>, vector<1x8x32xf32>,
      scf.yield %75, %73 : vector<8x64xf32>, vector<8x64xf32>
    }
    %c8_i32_17 = arith.constant 8 : i32
    %c0_18 = arith.constant 0 : index
    %c0_19 = arith.constant 0 : index
    %c0_20 = arith.constant 0 : index
    %32 = vector.load %arg1[%c0_18, %c0_19, %c0_20] : memref<8x8x1xf32, #tpu.memory_space<vmem>>, vector<8x8x1xf32>
    %c0_21 = arith.constant 0 : index
    %c0_22 = arith.constant 0 : index
    %c0_23 = arith.constant 0 : index
    %33 = vector.load %arg7[%c0_21, %c0_22, %c0_23] : memref<8x8x32xf32, #tpu.memory_space<vmem>>, vector<8x8x32xf32>
    %c0_24 = arith.constant 0 : index
    %c0_25 = arith.constant 0 : index
    %c0_26 = arith.constant 0 : index
    %34 = vector.load %arg8[%c0_24, %c0_25, %c0_26] : memref<8x8x32xf32, #tpu.memory_space<vmem>>, vector<8x8x32xf32>
    %35 = tpu.concatenate %33, %34 in 2 : vector<8x8x32xf32>, vector<8x8x32xf32> -> vector<8x8x64xf32>
    %36 = vector.broadcast %32 : vector<8x8x1xf32> to vector<8x8x64xf32>
    %37 = arith.mulf %35, %36 : vector<8x8x64xf32>
    %cst_27 = arith.constant 0.000000e+00 : f32
    %38 = vector.broadcast %cst_27 : f32 to vector<8x8x64xf32>
    %39 = tpu.concatenate %37, %38 in 2 : vector<8x8x64xf32>, vector<8x8x64xf32> -> vector<8x8x128xf32>
    %c0_28 = arith.constant 0 : index
    %c0_29 = arith.constant 0 : index
    %c0_30 = arith.constant 0 : index
    %40 = vector.load %arg5[%c0_28, %c0_29, %c0_30] : memref<8x8x128xf32, #tpu.memory_space<vmem>>, vector<8x8x128xf32>
    tpu.vector_store %arg5[%c0_28, %c0_29, %c0_30], %39 {strides = array<i32>} : memref<8x8x128xf32, #tpu.memory_space<vmem>>, vector<8x8x128xf32>,
    return
  }
}

</mosaic_0001>

<bundles_post_ra>
// kernel: tpu_custom_call.1
= control target key start
LH: loop header
LB: loop body
LE: loop exit
PB: predicated region body
PF: predicated region fallthrough
CT: control target
= control target key end

     0   :  { %10 = vsyncpa [#allocation6], 0  ;;  %s986_s0 = inlined_call_operand.vmem [shape: f32[8,8,33], index: 0, kind: input, shape index: {}]   ;;  %s987_s1 = inlined_call_operand.vmem [shape: f32[8,8,1], index: 1, kind: input, shape index: {}]   ;;  %s988_s2 = inlined_call_operand.hbm [shape: f32[33,256], index: 2, kind: input, shape index: {}]   ;;  %s989_s3 = inlined_call_operand.vmem [shape: f32[1,256], index: 3, kind: input, shape index: {}]   ;;  %s990_s4 = inlined_call_operand.hbm [shape: f32[64,256], index: 4, kind: input, shape index: {}]   ;;  %s991_s5 = inlined_call_operand.hbm [shape: f32[8,8,128], index: 5, kind: output, shape index: {}]  }
   0x1   :  { %11 = vsyncpa [#allocation9], 0 }
   0x2   :  { %12 = vsyncpa [#allocation7], 0  ;;  %s760_s18 = smov [#allocation5]  }
   0x3   :  { %s22_s19 = sshll.u32 %s760_s18, 4  ;;  %s23_s19 = int_to_ptr.vmem [resolvable:$true] %s22_s19 }
   0x4   :  { %s678_s20 = scalar_lea.vmem %s23_s19, 1280  ;;  %p683_p1 = scmp.lt.s32.totalorder %s23_s19, %s23_s19 }
   0x5   :  { %p679_p0 = scmp.ne.s32.totalorder %s23_s19, %s678_s20  ;;  %p684_p2 = scmp.lt.s32.totalorder %s678_s20, %s678_s20 }
   0x7   :  { %p685_p3 = por %p684_p2, %p683_p1 }
   0x9   :  { %p686_p4 = pnand %p685_p3, %p679_p0 }
   0xb   :  { %689 = shalt.err (!%p686_p4)
}
   0xc   :  { %s761_s21 = smov 256   ;;  %s762_s22 = smov 16  }
   0xd   :  { %28 = dma.hbm_to_vmem [thread:$0]  %s988_s2, 1280, %s23_s19, [#allocation6], %s761_s21, %s761_s21, %s762_s22  }
   0xe   :  { %s763_s25 = smov [#allocation8]  }
   0xf   :  { %s36_s26 = sshll.u32 %s763_s25, 4  ;;  %s37_s26 = int_to_ptr.vmem [resolvable:$true] %s36_s26 }
  0x10   :  { %s698_s27 = scalar_lea.vmem %s37_s26, 2048  ;;  %p703_p6 = scmp.lt.s32.totalorder %s37_s26, %s37_s26 }
  0x11   :  { %p699_p5 = scmp.ne.s32.totalorder %s37_s26, %s698_s27  ;;  %p704_p7 = scmp.lt.s32.totalorder %s698_s27, %s698_s27 }
  0x13   :  { %p705_p8 = por %p704_p7, %p703_p6 }
  0x15   :  { %p706_p9 = pnand %p705_p8, %p699_p5 }
  0x17   :  { %709 = shalt.err (!%p706_p9)
}
  0x18   :  { %42 = dma.hbm_to_vmem [thread:$0]  %s990_s4, 2048, %s37_s26, [#allocation9], %s761_s21, %s761_s21, %s762_s22  }
  0x19   :  { %742 = dma.done.wait [#allocation6], 1280  }
  0x1a   :  { %743 = vsyncadd [#allocation6], 4294966016 }
  0x1b   :  { %744 = dma.done.wait [#allocation9], 2048  }
  0x1c   :  { %745 = vsyncadd [#allocation9], 4294965248  ;;  %v764_v0 = vmov 0.0   ;;  %v811_v1 = vld [vmem:[#allocation8] sm:$0xff]  ;;  %v813_v2 = vld [vmem:[#allocation8 + $0x8] sm:$0xff]  ;;  %vm104_vm0 = vcmask 1040384   ;;  %v69_v35 = vlaneseq }
  0x1d   :  { %175 = vmatprep.mubr.f32.mxu0 %v764_v0  ;;  %199 = vmatprep.mubr.f32.mxu1 %v764_v0  ;;  %v815_v3 = vld [vmem:[#allocation8 + $0x10] sm:$0xff]  ;;  %v817_v4 = vld [vmem:[#allocation8 + $0x18] sm:$0xff]  ;;  %v819_v5 = vld [vmem:[#allocation8 + $0x20] sm:$0xff]  ;;  %vm79_vm1 = vcmask 269312  }
  0x1e   :  { %v821_v6 = vld [vmem:[#allocation8 + $0x28] sm:$0xff]  ;;  %v823_v7 = vld [vmem:[#allocation8 + $0x30] sm:$0xff]  ;;  %v825_v8 = vld [vmem:[#allocation8 + $0x38] sm:$0xff]  ;;  %v257_v36 = vand.u32 127, %v69_v35  ;;  %v70_v42 = vshrl.u32 %v69_v35, 7 }
  0x1f   :  { %v827_v9 = vld [vmem:[#allocation8 + $0x40] sm:$0xff]  ;;  %v829_v10 = vld [vmem:[#allocation8 + $0x48] sm:$0xff]  ;;  %v831_v11 = vld [vmem:[#allocation8 + $0x50] sm:$0xff] }
  0x20   :  { %v833_v12 = vld [vmem:[#allocation8 + $0x58] sm:$0xff]  ;;  %v835_v13 = vld [vmem:[#allocation8 + $0x60] sm:$0xff]  ;;  %v837_v14 = vld [vmem:[#allocation8 + $0x68] sm:$0xff]  ;;  %v258_v37 = vadd.s32 128, %v257_v36  ;;  %v263_v38 = vand.u32 63, %v257_v36  ;;  %v71_v43 = vsub.s32 0, %v70_v42 }
  0x21   :  { %v839_v15 = vld [vmem:[#allocation8 + $0x70] sm:$0xff]  ;;  %v841_v16 = vld [vmem:[#allocation8 + $0x78] sm:$0xff]  ;;  %v64_v19 = vld [vmem:[#allocation5 + $0x38] sm:$0xff]  ;;  %v75_v45 = vsub.s32 1, %v70_v42 }
  0x22   :  { %v66_v17 = vld [vmem:[#allocation5 + $0x48] sm:$0x1]  ;;  %v65_v18 = vld [vmem:[#allocation5 + $0x40] sm:$0x1]  ;;  %v63_v20 = vld [vmem:[#allocation5 + $0x30] sm:$0xff]  ;;  %v270_v39 = vand.u32 63, %v258_v37 }
  0x23   :  { %588 = vmatprep.subr.msk.mxu0 %vm104_vm0, %v66_v17  ;;  %609 = vmatprep.subr.msk.mxu1 %vm104_vm0, %v66_v17  ;;  %v62_v21 = vld [vmem:[#allocation5 + $0x28] sm:$0xff]  ;;  %v61_v22 = vld [vmem:[#allocation5 + $0x20] sm:$0xff]  ;;  %v60_v23 = vld [vmem:[#allocation5 + $0x18] sm:$0xff]  ;;  %vm881_vm2 = vcmp.lt.s32.totalorder %v263_v38, 32 }
  0x24   :  { %589 = vmatpush1.msk.msra.mxu0 %vm104_vm0, %v65_v18  ;;  %614 = vmatpush1.msk.msra.mxu1 %vm104_vm0, %v65_v18  ;;  %v59_v24 = vld [vmem:[#allocation5 + $0x10] sm:$0xff]  ;;  %v58_v25 = vld [vmem:[#allocation5 + $0x8] sm:$0xff]  ;;  %v57_v26 = vld [vmem:[#allocation5] sm:$0xff]  ;;  %vm885_vm3 = vcmp.lt.s32.totalorder %v270_v39, 32 }
  0x25   :  { %135 = vmatprep.subr.mxu0 %v64_v19  ;;  %610 = vmatprep.subr.mxu1 %v64_v19  ;;  %v49_v27 = vld [vmem:[%s986_s0] sm:$0xff]  ;;  %v50_v29 = vld [vmem:[%s986_s0 + $0x8] sm:$0xff]  ;;  %v51_v31 = vld [vmem:[%s986_s0 + $0x10] sm:$0xff] }
  0x26   :  { %136 = vmatpush1.msra.mxu0 %v63_v20  ;;  %615 = vmatpush1.msra.mxu1 %v63_v20  ;;  %v53_v28 = vld [vmem:[%s986_s0 + $0x20] sm:$0xff]  ;;  %v54_v30 = vld [vmem:[%s986_s0 + $0x28] sm:$0xff]  ;;  %v55_v32 = vld [vmem:[%s986_s0 + $0x30] sm:$0xff] }
  0x27   :  { %137 = vmatprep.subr.mxu0 %v62_v21  ;;  %611 = vmatprep.subr.mxu1 %v62_v21  ;;  %v52_v33 = vld [vmem:[%s986_s0 + $0x18] sm:$0xff]  ;;  %v67_v44 = vld [vmem:[%s989_s3] sm:$0x3]  ;;  %s896_s3 = smov 0  }
  0x28   :  { %138 = vmatpush1.msra.mxu0 %v61_v22  ;;  %616 = vmatpush1.msra.mxu1 %v61_v22  ;;  %v56_v34 = vld [vmem:[%s986_s0 + $0x38] sm:$0xff]  ;;  %v72_v46 = vrot.slane %v67_v44, %v71_v43  ;;  %v76_v47 = vrot.slane %v67_v44, %v75_v45 }
  0x29   :  { %139 = vmatprep.subr.mxu0 %v60_v23  ;;  %612 = vmatprep.subr.mxu1 %v60_v23 }
  0x2a   :  { %140 = vmatpush1.msra.mxu0 %v59_v24  ;;  %617 = vmatpush1.msra.mxu1 %v59_v24 }
  0x2b   :  { %141 = vmatprep.subr.mxu0 %v58_v25  ;;  %613 = vmatprep.subr.mxu1 %v58_v25 }
  0x2c   :  { %142 = vmatpush1.msra.mxu0 %v57_v26  ;;  %618 = vmatpush1.msra.mxu1 %v57_v26 }
  0x2d   :  { %590 = vmatmul.mubr.msk.f32.vlgmr.msra.gmra.mxu0 %vm79_vm1, %v49_v27  ;;  %594 = vmatmul.mubr.msk.f32.vlgmr.msra.gmra.mxu1 %vm79_vm1, %v53_v28 }
  0x2e   :  { %181 = vmatprep.mubr.f32.mxu0 %v764_v0  ;;  %205 = vmatprep.mubr.f32.mxu1 %v764_v0 }
  0x31   :  { %591 = vmatmul.mubr.msk.f32.gmra.mxu0 %vm79_vm1, %v50_v29  ;;  %595 = vmatmul.mubr.msk.f32.gmra.mxu1 %vm79_vm1, %v54_v30 }
  0x32   :  { %187 = vmatprep.mubr.f32.mxu0 %v764_v0  ;;  %211 = vmatprep.mubr.f32.mxu1 %v764_v0 }
  0x35   :  { %592 = vmatmul.mubr.msk.f32.gmra.mxu0 %vm79_vm1, %v51_v31  ;;  %596 = vmatmul.mubr.msk.f32.gmra.mxu1 %vm79_vm1, %v55_v32  ;;  %v892_v32 = vmov 0.0  }
  0x36   :  { %193 = vmatprep.mubr.f32.mxu0 %v764_v0  ;;  %217 = vmatprep.mubr.f32.mxu1 %v764_v0 }
  0x39   :  { %593 = vmatmul.mubr.msk.f32.gmra.mxu0 %vm79_vm1, %v52_v33  ;;  %597 = vmatmul.mubr.msk.f32.gmra.mxu1 %vm79_vm1, %v56_v34  ;;  %v894_v33 = vmov 0.0  }
  0xed   :  { %v177_v48 = vpop.f32.mrf.mxu0  ;;  %v201_v49 = vpop.f32.mrf.mxu1 }
  0xee   :  { %v178_v50 = vadd.f32 %v177_v48, %v72_v46  ;;  %v202_v51 = vadd.f32 %v201_v49, %v72_v46 }
  0xef   :  { %v179_v52 = vpop.f32.mrf.mxu0  ;;  %v203_v53 = vpop.f32.mrf.mxu1 }
  0xf0   :  { %224 = vst [vmem:[#allocation2] sm:$0xff] %v178_v50  ;;  %232 = vst [vmem:[#allocation2 + $0x40] sm:$0xff] %v202_v51  ;;  %v180_v54 = vadd.f32 %v179_v52, %v76_v47  ;;  %v204_v55 = vadd.f32 %v203_v53, %v76_v47 }
  0xf1   :  { %v183_v56 = vpop.f32.mrf.mxu0  ;;  %v207_v57 = vpop.f32.mrf.mxu1 }
  0xf2   :  { %225 = vst [vmem:[#allocation2 + $0x8] sm:$0xff] %v180_v54  ;;  %233 = vst [vmem:[#allocation2 + $0x48] sm:$0xff] %v204_v55  ;;  %v184_v58 = vadd.f32 %v183_v56, %v72_v46  ;;  %v208_v59 = vadd.f32 %v207_v57, %v72_v46 }
  0xf3   :  { %v185_v60 = vpop.f32.mrf.mxu0  ;;  %v209_v61 = vpop.f32.mrf.mxu1 }
  0xf4   :  { %226 = vst [vmem:[#allocation2 + $0x10] sm:$0xff] %v184_v58  ;;  %234 = vst [vmem:[#allocation2 + $0x50] sm:$0xff] %v208_v59  ;;  %v186_v62 = vadd.f32 %v185_v60, %v76_v47  ;;  %v210_v63 = vadd.f32 %v209_v61, %v76_v47 }
  0xf5   :  { %v189_v0 = vpop.f32.mrf.mxu0  ;;  %v213_v17 = vpop.f32.mrf.mxu1 }
  0xf6   :  { %227 = vst [vmem:[#allocation2 + $0x18] sm:$0xff] %v186_v62  ;;  %235 = vst [vmem:[#allocation2 + $0x58] sm:$0xff] %v210_v63  ;;  %v190_v18 = vadd.f32 %v189_v0, %v72_v46  ;;  %v214_v19 = vadd.f32 %v213_v17, %v72_v46 }
  0xf7   :  { %v191_v20 = vpop.f32.mrf.mxu0  ;;  %v215_v21 = vpop.f32.mrf.mxu1 }
  0xf8   :  { %228 = vst [vmem:[#allocation2 + $0x20] sm:$0xff] %v190_v18  ;;  %236 = vst [vmem:[#allocation2 + $0x60] sm:$0xff] %v214_v19  ;;  %v192_v22 = vadd.f32 %v191_v20, %v76_v47  ;;  %v216_v23 = vadd.f32 %v215_v21, %v76_v47 }
  0xf9   :  { %v195_v24 = vpop.f32.mrf.mxu0  ;;  %v219_v25 = vpop.f32.mrf.mxu1 }
  0xfa   :  { %229 = vst [vmem:[#allocation2 + $0x28] sm:$0xff] %v192_v22  ;;  %237 = vst [vmem:[#allocation2 + $0x68] sm:$0xff] %v216_v23  ;;  %v196_v26 = vadd.f32 %v195_v24, %v72_v46  ;;  %v220_v27 = vadd.f32 %v219_v25, %v72_v46 }
  0xfb   :  { %v197_v28 = vpop.f32.mrf.mxu0  ;;  %v221_v29 = vpop.f32.mrf.mxu1 }
  0xfc   :  { %230 = vst [vmem:[#allocation2 + $0x30] sm:$0xff] %v196_v26  ;;  %238 = vst [vmem:[#allocation2 + $0x70] sm:$0xff] %v220_v27  ;;  %v198_v30 = vadd.f32 %v197_v28, %v76_v47  ;;  %v222_v31 = vadd.f32 %v221_v29, %v76_v47 }
  0xfe   :  { %231 = vst [vmem:[#allocation2 + $0x38] sm:$0xff] %v198_v30  ;;  %239 = vst [vmem:[#allocation2 + $0x78] sm:$0xff] %v222_v31 }
  0xff LB: > { %328 = vmatprep.subr.mxu0 %v841_v16  ;;  %v765_v34 = vmov 0.0   ;;  %s766_s20 = smov 64   ;;  %vm309_vm4 = vcmask 523264   ;;  %s293_s21 = ssub.s32 7, %s758_s3  ;;  %vm413_vm5 = vcmask 261120   ;;  %s758_s3 = sphi %s896_s3, %s290_s3   ;;  %v754_v33 = vphi %v894_v33, %v406_v33   ;;  %v750_v32 = vphi %v892_v32, %v404_v32  }
 0x100   : > { %329 = vmatpush1.msra.mxu0 %v839_v15  ;;  %376 = vmatprep.mubr.f32.mxu0 %v765_v34  ;;  %s607_s22 = sshll.u32 %s758_s3, 4  ;;  %s608_s23 = sshll.u32 %s293_s21, 4 }
 0x101   : > { %307 = vrot.lane.b32.xlu0 %v754_v33, %s766_s20  ;;  %330 = vmatprep.subr.mxu0 %v837_v14  ;;  %s296_s24 = scalar_lea.vmem [#allocation2], %s607_s22  ;;  %s301_s25 = scalar_lea.vmem [#allocation2], %s608_s23 }
 0x102   : > { %331 = vmatpush1.msra.mxu0 %v835_v13  ;;  %s767_s26 = smov 32   ;;  %s605_s27 = sshll.u32 %s758_s3, 3 }
 0x103   : > { %332 = vmatprep.subr.mxu0 %v833_v12  ;;  %s606_s28 = sshll.u32 %s293_s21, 3  ;;  %s412_s29 = scalar_lea.vmem [#allocation3], %s605_s27 }
 0x104   : > { %333 = vmatpush1.msra.mxu0 %v831_v11  ;;  %s419_s2 = scalar_lea.vmem [#allocation4], %s606_s28  ;;  %s290_s3 = sadd.s32 1, %s758_s3  }
 0x105   : > { %334 = vmatprep.subr.mxu0 %v829_v10  ;;  %v297_v36 = vld [vmem:[%s296_s24] sm:$0xff]  ;;  %v298_v44 = vld [vmem:[%s296_s24 + $0x8] sm:$0xff]  ;;  %p287_p10 = scmp.ge.s32.totalorder %s290_s3, 8  }
 0x106   : > { %335 = vmatpush1.msra.mxu0 %v827_v9  ;;  %v302_v37 = vld [vmem:[%s301_s25] sm:$0xff]  ;;  %v303_v45 = vld [vmem:[%s301_s25 + $0x8] sm:$0xff]  ;;  %v423_v63 = vld [vmem:[%s987_s1 + $0x10] sm:$0xff] (%p287_p10)  ;;  %v768_v17 = vmov (%p287_p10), 0   ;;  %s769_s19 = smov (%p287_p10), 32  }
 0x107   : > { %336 = vmatprep.subr.mxu0 %v825_v8  ;;  %v304_v38 = vsel %vm881_vm2, %v297_v36, %v302_v37  ;;  %v305_v46 = vsel %vm885_vm3, %v298_v44, %v303_v45  ;;  %v421_v0 = vld [vmem:[%s987_s1] sm:$0xff] (%p287_p10)  ;;  %669 = vset.pattern.permute.xlu1 (%p287_p10), %v768_v17  ;;  %v424_v18 = vld [vmem:[%s987_s1 + $0x18] sm:$0xff] (%p287_p10) }
 0x108   : > { %337 = vmatpush1.msra.mxu0 %v823_v7  ;;  %668 = vset.pattern.permute.xlu0 (%p287_p10), %v768_v17 }
 0x109   : > { %338 = vmatprep.subr.mxu0 %v821_v6 }
 0x10a   : > { %339 = vmatpush1.msra.mxu0 %v819_v5  ;;  %v427_v5 = vld [vmem:[%s987_s1 + $0x30] sm:$0xff] (%p287_p10) }
 0x10b   : > { %340 = vmatprep.subr.mxu0 %v817_v4  ;;  %v428_v4 = vld [vmem:[%s987_s1 + $0x38] sm:$0xff] (%p287_p10) }
 0x10c   : > { %341 = vmatpush1.msra.mxu0 %v815_v3  ;;  %v425_v3 = vld [vmem:[%s987_s1 + $0x20] sm:$0xff] (%p287_p10) }
 0x10d   : > { %342 = vmatprep.subr.mxu0 %v813_v2  ;;  %v426_v2 = vld [vmem:[%s987_s1 + $0x28] sm:$0xff] (%p287_p10) }
 0x10e   : > { %343 = vmatpush1.msra.mxu0 %v811_v1  ;;  %v422_v1 = vld [vmem:[%s987_s1 + $0x8] sm:$0xff] (%p287_p10)  ;;  %s770_s1 = smov (%p287_p10), [#allocation10]  }
 0x10f   :  { %s556_s3 = sshll.u32 (%p287_p10), %s770_s1, 4  ;;  %s557_s3 = int_to_ptr.vmem [resolvable:$true] %s556_s3 }
 0x110   :  { %p715_p12 = scmp.lt.s32.totalorder (%p287_p10), %s557_s3, %s557_s3 }
 0x173   : > { %v308_v35 = vpop.permute.xlu0 %307 }
 0x174   : > { %602 = vmatmul.mubr.msk.f32.vlgmr.msra.gmra.mxu0 %vm309_vm4, %v308_v35 }
 0x234   : > { %v378_v39 = vpop.f32.mrf.mxu0 }
 0x235   : > { %v383_v42 = vadd.f32 %v378_v39, %v304_v38 }
 0x236   : > { %v380_v47 = vpop.f32.mrf.mxu0 }
 0x237   : > { %v603_v43 = vmul.f32 -1.442695, %v383_v42  ;;  %v384_v48 = vadd.f32 %v380_v47, %v305_v46 }
 0x239   : > { %656 = vpow2.f32 %v603_v43  ;;  %v604_v54 = vmul.f32 -1.442695, %v384_v48 }
 0x23a   : > { %658 = vtanh.f32 %v384_v48 }
 0x246   : > { %v657_v49 = vpop.eup %656 }
 0x247   : > { %v388_v50 = vadd.f32 1.0, %v657_v49  ;;  %v659_v51 = vpop.eup %658 }
 0x249   : > { %660 = vrcp.f32 %v388_v50 }
 0x24a   : > { %662 = vpow2.f32 %v604_v54 }
 0x256   : > { %v661_v52 = vpop.eup %660 }
 0x257   : > { %v399_v53 = vmul.f32 %v661_v52, %v659_v51  ;;  %v663_v55 = vpop.eup %662  ;;  %v398_v57 = vmul.f32 %v750_v32, %v661_v52 }
 0x258   : > { %v395_v56 = vadd.f32 1.0, %v663_v55 }
 0x259   : > { %401 = vrot.lane.b32.xlu0 %v399_v53, %s766_s20 }
 0x25a   : > { %664 = vrcp.f32 %v395_v56 }
 0x25d   :  { %488 = vperm.xlu0 (%p287_p10), %668, %v421_v0  }
 0x261   :  { %493 = vperm.xlu0 (%p287_p10), %668, %v422_v1  }
 0x265   :  { %508 = vperm.xlu0 (%p287_p10), %668, %v425_v3  }
 0x267   : > { %v665_v59 = vpop.eup %664 }
 0x269   :  { %518 = vperm.xlu0 (%p287_p10), %668, %v427_v5  }
 0x2cb   : > { %v402_v58 = vpop.permute.xlu0 %401 }
 0x2cc   : > { %v404_v32 = vadd.f32 %v402_v58, %v398_v57  }
 0x2ce   : > { %666 = vtanh.f32 %v404_v32 }
 0x2d8   :  { %v489_v15 = vpop.permute.xlu0 (%p287_p10), %488 }
 0x2db   : > { %v667_v60 = vpop.eup %666 }
 0x2dc   : > { %v406_v33 = vmul.f32 %v667_v60, %v665_v59   ;;  %v494_v40 = vpop.permute.xlu0 (%p287_p10), %493 }
 0x2de   : > { %408 = vrot.lane.b32.xlu1 %v406_v33, %s766_s20  ;;  %s710_s20 = scalar_lea.vmem (%p287_p10), %s557_s3, 1024 }
 0x2df   :  { %p711_p11 = scmp.ne.s32.totalorder (%p287_p10), %s557_s3, %s710_s20  ;;  %p716_p13 = scmp.lt.s32.totalorder (%p287_p10), %s710_s20, %s710_s20 }
 0x2e0   :  { %v509_v19 = vpop.permute.xlu0 (%p287_p10), %508 }
 0x2e1   :  { %p717_p0 = por (%p287_p10), %p716_p13, %p715_p12 }
 0x2e2   : > { %415 = vrot.lane.b32.xlu1 %v406_v33, %s767_s26 }
 0x2e3   :  { %p718_p1 = pnand (%p287_p10), %p717_p0, %p711_p11 }
 0x2e4   :  { %v519_v21 = vpop.permute.xlu0 (%p287_p10), %518 }
 0x2e6   :  { %498 = vperm.xlu1 (%p287_p10), %669, %v423_v63  }
 0x2ea   :  { %503 = vperm.xlu1 (%p287_p10), %669, %v424_v18  }
 0x2ee   :  { %513 = vperm.xlu1 (%p287_p10), %669, %v426_v2  }
 0x2f2   :  { %523 = vperm.xlu1 (%p287_p10), %669, %v428_v4  }
 0x350   : > { %v409_v61 = vpop.permute.xlu1 %408 }
 0x351   : > { %414 = vst.msk [vmem:[%s412_s29] sm:$0xff] %vm413_vm5, %v409_v61  ;;  %289 = sbr.rel (!%p287_p10) target bundleno = 255 (0xff), region = 59 }
 0x354   : > { %v416_v62 = vpop.permute.xlu1 %415 }
 0x355   : > { %420 = vst.msk [vmem:[%s419_s2] sm:$0xff] %vm413_vm5, %v416_v62 }
 0x358   :  { %v430_v22 = vld [vmem:[#allocation3 + $0x8] sm:$0xff]  ;;  %v429_v23 = vld [vmem:[#allocation3] sm:$0xff]  ;;  %v432_v30 = vld [vmem:[#allocation3 + $0x18] sm:$0xff] }
 0x359   :  { %v431_v31 = vld [vmem:[#allocation3 + $0x10] sm:$0xff]  ;;  %v434_v42 = vld [vmem:[#allocation3 + $0x28] sm:$0xff]  ;;  %v433_v43 = vld [vmem:[#allocation3 + $0x20] sm:$0xff] }
 0x35a   :  { %v436_v52 = vld [vmem:[#allocation3 + $0x38] sm:$0xff]  ;;  %v435_v53 = vld [vmem:[#allocation3 + $0x30] sm:$0xff] }
 0x35c   :  { %v438_v6 = vld [vmem:[#allocation4 + $0x8] sm:$0xff]  ;;  %v437_v7 = vld [vmem:[#allocation4] sm:$0xff]  ;;  %v440_v8 = vld [vmem:[#allocation4 + $0x18] sm:$0xff] }
 0x35d   :  { %455 = vrot.lane.b32.xlu1 %v438_v6, %s769_s19  ;;  %453 = vrot.lane.b32.xlu0 %v437_v7, %s769_s19  ;;  %v439_v9 = vld [vmem:[#allocation4 + $0x10] sm:$0xff]  ;;  %v442_v10 = vld [vmem:[#allocation4 + $0x28] sm:$0xff]  ;;  %v441_v11 = vld [vmem:[#allocation4 + $0x20] sm:$0xff] }
 0x35e   :  { %v444_v12 = vld [vmem:[#allocation4 + $0x38] sm:$0xff]  ;;  %v443_v13 = vld [vmem:[#allocation4 + $0x30] sm:$0xff] }
 0x361   :  { %459 = vrot.lane.b32.xlu1 %v440_v8, %s769_s19  ;;  %457 = vrot.lane.b32.xlu0 %v439_v9, %s769_s19  ;;  %v499_v14 = vpop.permute.xlu1 %498 }
 0x365   :  { %463 = vrot.lane.b32.xlu1 %v442_v10, %s769_s19  ;;  %461 = vrot.lane.b32.xlu0 %v441_v11, %s769_s19  ;;  %v504_v16 = vpop.permute.xlu1 %503 }
 0x369   :  { %467 = vrot.lane.b32.xlu1 %v444_v12, %s769_s19  ;;  %465 = vrot.lane.b32.xlu0 %v443_v13, %s769_s19  ;;  %v514_v41 = vpop.permute.xlu1 %513 }
 0x36d   :  { %v524_v20 = vpop.permute.xlu1 %523 }
 0x3cf   :  { %v456_v24 = vpop.permute.xlu1 %455  ;;  %v454_v25 = vpop.permute.xlu0 %453 }
 0x3d0   :  { %v479_v26 = vsel %vm413_vm5, %v430_v22, %v456_v24  ;;  %v478_v27 = vsel %vm413_vm5, %v429_v23, %v454_v25 }
 0x3d1   :  { %v527_v28 = vmul.f32 %v494_v40, %v479_v26  ;;  %v526_v29 = vmul.f32 %v489_v15, %v478_v27 }
 0x3d3   :  { %v536_v32 = vsel %vm309_vm4, %v527_v28, 0.0  ;;  %v535_v33 = vsel %vm309_vm4, %v526_v29, 0.0  ;;  %v460_v34 = vpop.permute.xlu1 %459  ;;  %v458_v35 = vpop.permute.xlu0 %457 }
 0x3d4   :  { %544 = vst [vmem:[#allocation10 + $0x8] sm:$0xff] %v536_v32  ;;  %543 = vst [vmem:[#allocation10] sm:$0xff] %v535_v33  ;;  %v481_v36 = vsel %vm413_vm5, %v432_v30, %v460_v34  ;;  %v480_v37 = vsel %vm413_vm5, %v431_v31, %v458_v35 }
 0x3d5   :  { %v529_v38 = vmul.f32 %v504_v16, %v481_v36  ;;  %v528_v39 = vmul.f32 %v499_v14, %v480_v37 }
 0x3d7   :  { %v538_v44 = vsel %vm309_vm4, %v529_v38, 0.0  ;;  %v537_v45 = vsel %vm309_vm4, %v528_v39, 0.0  ;;  %v464_v46 = vpop.permute.xlu1 %463  ;;  %v462_v47 = vpop.permute.xlu0 %461 }
 0x3d8   :  { %546 = vst [vmem:[#allocation10 + $0x18] sm:$0xff] %v538_v44  ;;  %545 = vst [vmem:[#allocation10 + $0x10] sm:$0xff] %v537_v45  ;;  %v483_v48 = vsel %vm413_vm5, %v434_v42, %v464_v46  ;;  %v482_v49 = vsel %vm413_vm5, %v433_v43, %v462_v47 }
 0x3d9   :  { %v531_v50 = vmul.f32 %v514_v41, %v483_v48  ;;  %v530_v51 = vmul.f32 %v509_v19, %v482_v49 }
 0x3db   :  { %v540_v54 = vsel %vm309_vm4, %v531_v50, 0.0  ;;  %v539_v55 = vsel %vm309_vm4, %v530_v51, 0.0  ;;  %v468_v56 = vpop.permute.xlu1 %467  ;;  %v466_v57 = vpop.permute.xlu0 %465 }
 0x3dc   :  { %548 = vst [vmem:[#allocation10 + $0x28] sm:$0xff] %v540_v54  ;;  %547 = vst [vmem:[#allocation10 + $0x20] sm:$0xff] %v539_v55  ;;  %v485_v58 = vsel %vm413_vm5, %v436_v52, %v468_v56  ;;  %v484_v59 = vsel %vm413_vm5, %v435_v53, %v466_v57 }
 0x3dd   :  { %v533_v60 = vmul.f32 %v524_v20, %v485_v58  ;;  %v532_v61 = vmul.f32 %v519_v21, %v484_v59 }
 0x3df   :  { %v542_v62 = vsel %vm309_vm4, %v533_v60, 0.0  ;;  %v541_v63 = vsel %vm309_vm4, %v532_v61, 0.0 }
 0x3e0   :  { %550 = vst [vmem:[#allocation10 + $0x38] sm:$0xff] %v542_v62  ;;  %549 = vst [vmem:[#allocation10 + $0x30] sm:$0xff] %v541_v63 }
 0x3e1   :  { %721 = shalt.err (!%p718_p1)
}
 0x3e2   :  { %s771_s21 = smov 128   ;;  %s772_s22 = smov 8  }
 0x3e3   :  { %562 = dma.vmem_to_hbm [thread:$0]  %s557_s3, 1024, %s991_s5, [#allocation7], %s771_s21, %s771_s21, %s772_s22  }
 0x3e4   :  { %746 = dma.done.wait [#allocation7], 1024  }
 0x3e5   :  { %747 = vsyncadd [#allocation7], 4294966272 }
 0x3e6   :  { %566 = vsyncpa [#allocation6], 1 }
 0x3e7   :  { %567 = vsyncpa [#allocation9], 1 }
 0x3e8   :  { %568 = vsyncpa [#allocation7], 1 }

</bundles_post_ra>
